<compile_context>
chip_gen: v6e
topology: v6e:2x2x1
jax: 0.10.0
libtpu: 0.0.40
codegen_flags: <defaults>
</compile_context>

<pallas_src>
import jax
import jax.numpy as jnp
from jax.experimental import pallas as pl
from jax.experimental.pallas import tpu as pltpu

INPUT_SIZE = 3
HIDDEN_SIZE = 32
OUTPUT_SIZE = 3
TILE_B = 512  # batch tile on the lane axis; multiple of 128


def ff_kernel(xT_ref, w1_ref, b1_ref, w2_ref, b2_ref, oT_ref):
    # Lane-dense: batch lives on the last (128-lane) axis of every tile.
    xT = xT_ref[...]                              # (INPUT_SIZE, TILE_B) f32
    w1 = w1_ref[...]                              # (HIDDEN_SIZE, INPUT_SIZE)

    # Layer 1: K = INPUT_SIZE = 3 -> explicit broadcast FMAs on the VPU instead of
    # burning an MXU pass (and MRF pop latency) on a 3-deep contraction.
    hT = b1_ref[...] + w1[:, 0:1] * xT[0:1, :]    # (HIDDEN, 1)*(1, TILE_B) -> (HIDDEN, TILE_B)
    for k in range(1, INPUT_SIZE):
        hT = hT + w1[:, k:k + 1] * xT[k:k + 1, :]
    hT = jnp.maximum(hT, 0.0)                     # ReLU, (HIDDEN_SIZE, TILE_B)

    # Layer 2: K = HIDDEN_SIZE = 32 -> MXU matmul, accumulate in f32.
    yT = jnp.dot(w2_ref[...], hT, preferred_element_type=jnp.float32)
    oT_ref[...] = (yT + b2_ref[...]).astype(oT_ref.dtype)


def ff_forward(x, w1, b1, w2, b2, *, tile_b=TILE_B):
    """Forward pass of FFModel.

    x : (B, INPUT_SIZE) f32
    Weights in PyTorch nn.Linear layout:
      w1: (HIDDEN_SIZE, INPUT_SIZE), b1: (HIDDEN_SIZE,)
      w2: (OUTPUT_SIZE, HIDDEN_SIZE), b2: (OUTPUT_SIZE,)
    Returns (B, OUTPUT_SIZE) f32.
    """
    B = x.shape[0]
    # Lane-dense layout: batch on the last axis, padded to a multiple of the tile.
    B_pad = pl.cdiv(B, tile_b) * tile_b
    xT = jnp.zeros((INPUT_SIZE, B_pad), x.dtype).at[:, :B].set(x.T)
    b1c = b1.reshape(HIDDEN_SIZE, 1).astype(jnp.float32)
    b2c = b2.reshape(OUTPUT_SIZE, 1).astype(jnp.float32)

    n_tiles = B_pad // tile_b
    flops = 2 * B_pad * (INPUT_SIZE * HIDDEN_SIZE + HIDDEN_SIZE * OUTPUT_SIZE)
    bytes_accessed = 4 * (xT.size + OUTPUT_SIZE * B_pad
                          + w1.size + b1.size + w2.size + b2.size)

    yT = pl.pallas_call(
        ff_kernel,
        out_shape=jax.ShapeDtypeStruct((OUTPUT_SIZE, B_pad), jnp.float32),
        grid=(n_tiles,),
        in_specs=[
            # Batch-tiled input (lane-dense), pipelined/double-buffered by Pallas.
            pl.BlockSpec((INPUT_SIZE, tile_b), lambda i: (0, i)),
            # Weights/biases: constant block index -> resident in VMEM across steps.
            pl.BlockSpec((HIDDEN_SIZE, INPUT_SIZE), lambda i: (0, 0)),
            pl.BlockSpec((HIDDEN_SIZE, 1), lambda i: (0, 0)),
            pl.BlockSpec((OUTPUT_SIZE, HIDDEN_SIZE), lambda i: (0, 0)),
            pl.BlockSpec((OUTPUT_SIZE, 1), lambda i: (0, 0)),
        ],
        out_specs=pl.BlockSpec((OUTPUT_SIZE, tile_b), lambda i: (0, i)),
        compiler_params=pltpu.CompilerParams(
            dimension_semantics=("parallel",),
        ),
        cost_estimate=pl.CostEstimate(
            flops=flops, transcendentals=0, bytes_accessed=bytes_accessed),
    )(xT, w1.astype(jnp.float32), b1c, w2.astype(jnp.float32), b2c)

    # Drop batch padding and return row-major (B, OUTPUT_SIZE).
    return yT[:, :B].T


def init_params(key):
    """Deterministic init mimicking nn.Linear default: U(-1/sqrt(fan_in), 1/sqrt(fan_in)).
    Weights kept in PyTorch (out_features, in_features) layout, which is exactly what
    the transposed (lane-dense) kernel consumes."""
    k1, k2, k3, k4 = jax.random.split(key, 4)
    bnd1 = 1.0 / jnp.sqrt(INPUT_SIZE)
    bnd2 = 1.0 / jnp.sqrt(HIDDEN_SIZE)
    w1 = jax.random.uniform(k1, (HIDDEN_SIZE, INPUT_SIZE), jnp.float32, -bnd1, bnd1)
    b1 = jax.random.uniform(k2, (HIDDEN_SIZE,), jnp.float32, -bnd1, bnd1)
    w2 = jax.random.uniform(k3, (OUTPUT_SIZE, HIDDEN_SIZE), jnp.float32, -bnd2, bnd2)
    b2 = jax.random.uniform(k4, (OUTPUT_SIZE,), jnp.float32, -bnd2, bnd2)
    return w1, b1, w2, b2


def reference_forward(x, w1, b1, w2, b2):
    h = jnp.maximum(x @ w1.T + b1, 0.0)
    return h @ w2.T + b2


if __name__ == "__main__":
    key = jax.random.PRNGKey(0)
    kx, kp = jax.random.split(key)
    batch = 8  # note: at this size the workload is launch-overhead dominated; the
    # lane-dense batch-tiled kernel is designed for large B (multiples of TILE_B).
    x = jax.random.normal(kx, (batch, INPUT_SIZE), jnp.float32)
    w1, b1, w2, b2 = init_params(kp)

    out = ff_forward(x, w1, b1, w2, b2)
    out = jax.block_until_ready(out)

    ref = reference_forward(x, w1, b1, w2, b2)
    assert out.shape == (batch, OUTPUT_SIZE)
    assert jnp.allclose(out, ref, atol=1e-4, rtol=1e-4), "mismatch vs reference"
    print("KERNEL_OK")
</pallas_src>

<mosaic_0001>
module attributes {stable_mosaic.version = 11 : i64} {
  func.func @ff_kernel(%arg0: i32, %arg1: memref<3x512xf32, #tpu.memory_space<vmem>>, %arg2: memref<32x3xf32, #tpu.memory_space<vmem>>, %arg3: memref<32x1xf32, #tpu.memory_space<vmem>>, %arg4: memref<3x32xf32, #tpu.memory_space<vmem>>, %arg5: memref<3x1xf32, #tpu.memory_space<vmem>>, %arg6: memref<3x512xf32, #tpu.memory_space<vmem>>) attributes {dimension_semantics = [#tpu.dimension_semantics<parallel>], iteration_bounds = array<i64: 1>, scalar_prefetch = 0 : i64, scratch_operands = 0 : i64, tpu.core_type = #tpu.core_type<tc>, window_params = [{transform_indices = @transform_0, window_bounds = array<i64: 3, 512>}, {pipeline_mode = #tpu.pipeline_mode<synchronous>, transform_indices = @transform_1, window_bounds = array<i64: 32, 3>}, {pipeline_mode = #tpu.pipeline_mode<synchronous>, transform_indices = @transform_2, window_bounds = array<i64: 32, 1>}, {pipeline_mode = #tpu.pipeline_mode<synchronous>, transform_indices = @transform_3, window_bounds = array<i64: 3, 32>}, {pipeline_mode = #tpu.pipeline_mode<synchronous>, transform_indices = @transform_4, window_bounds = array<i64: 3, 1>}, {transform_indices = @transform_5, window_bounds = array<i64: 3, 512>}]} {
    %c0 = arith.constant 0 : index
    %c0_0 = arith.constant 0 : index
    %0 = vector.load %arg1[%c0, %c0_0] : memref<3x512xf32, #tpu.memory_space<vmem>>, vector<3x512xf32>
    %c0_1 = arith.constant 0 : index
    %c0_2 = arith.constant 0 : index
    %1 = vector.load %arg2[%c0_1, %c0_2] : memref<32x3xf32, #tpu.memory_space<vmem>>, vector<32x3xf32>
    %c0_3 = arith.constant 0 : index
    %c0_4 = arith.constant 0 : index
    %2 = vector.load %arg3[%c0_3, %c0_4] : memref<32x1xf32, #tpu.memory_space<vmem>>, vector<32x1xf32>
    %3 = vector.extract_strided_slice %1 {offsets = [0, 0], sizes = [32, 1], strides = [1, 1]} : vector<32x3xf32> to vector<32x1xf32>
    %4 = vector.extract_strided_slice %0 {offsets = [0, 0], sizes = [1, 512], strides = [1, 1]} : vector<3x512xf32> to vector<1x512xf32>
    %5 = vector.broadcast %3 : vector<32x1xf32> to vector<32x512xf32>
    %6 = vector.broadcast %4 : vector<1x512xf32> to vector<32x512xf32>
    %7 = arith.mulf %5, %6 : vector<32x512xf32>
    %8 = vector.broadcast %2 : vector<32x1xf32> to vector<32x512xf32>
    %9 = arith.addf %8, %7 : vector<32x512xf32>
    %10 = vector.extract_strided_slice %1 {offsets = [0, 1], sizes = [32, 1], strides = [1, 1]} : vector<32x3xf32> to vector<32x1xf32>
    %11 = vector.extract_strided_slice %0 {offsets = [1, 0], sizes = [1, 512], strides = [1, 1]} : vector<3x512xf32> to vector<1x512xf32>
    %12 = vector.broadcast %10 : vector<32x1xf32> to vector<32x512xf32>
    %13 = vector.broadcast %11 : vector<1x512xf32> to vector<32x512xf32>
    %14 = arith.mulf %12, %13 : vector<32x512xf32>
    %15 = arith.addf %9, %14 : vector<32x512xf32>
    %16 = vector.extract_strided_slice %1 {offsets = [0, 2], sizes = [32, 1], strides = [1, 1]} : vector<32x3xf32> to vector<32x1xf32>
    %17 = vector.extract_strided_slice %0 {offsets = [2, 0], sizes = [1, 512], strides = [1, 1]} : vector<3x512xf32> to vector<1x512xf32>
    %18 = vector.broadcast %16 : vector<32x1xf32> to vector<32x512xf32>
    %19 = vector.broadcast %17 : vector<1x512xf32> to vector<32x512xf32>
    %20 = arith.mulf %18, %19 : vector<32x512xf32>
    %21 = arith.addf %15, %20 : vector<32x512xf32>
    %cst = arith.constant 0.000000e+00 : f32
    %22 = vector.broadcast %cst : f32 to vector<32x512xf32>
    %23 = arith.maximumf %21, %22 : vector<32x512xf32>
    %c0_5 = arith.constant 0 : index
    %c0_6 = arith.constant 0 : index
    %24 = vector.load %arg4[%c0_5, %c0_6] : memref<3x32xf32, #tpu.memory_space<vmem>>, vector<3x32xf32>
    %cst_7 = arith.constant dense<0.000000e+00> : vector<3x512xf32>
    %25 = tpu.matmul %24, %23, %cst_7 {dimension_numbers = #tpu.dot_dimension_numbers<[1], [0], [0], [1], [0, 0, 1, 1], [], []>} : vector<3x32xf32>, vector<32x512xf32>, vector<3x512xf32> -> vector<3x512xf32>
    %c0_8 = arith.constant 0 : index
    %c0_9 = arith.constant 0 : index
    %26 = vector.load %arg5[%c0_8, %c0_9] : memref<3x1xf32, #tpu.memory_space<vmem>>, vector<3x1xf32>
    %27 = vector.broadcast %26 : vector<3x1xf32> to vector<3x512xf32>
    %28 = arith.addf %25, %27 : vector<3x512xf32>
    %c0_10 = arith.constant 0 : index
    %c0_11 = arith.constant 0 : index
    %29 = vector.load %arg6[%c0_10, %c0_11] : memref<3x512xf32, #tpu.memory_space<vmem>>, vector<3x512xf32>
    tpu.vector_store %arg6[%c0_10, %c0_11], %28 {strides = array<i32>} : memref<3x512xf32, #tpu.memory_space<vmem>>, vector<3x512xf32>,
    return
  }
  func.func @transform_0(%arg0: i32) -> (i32, i32) {
    %c0_i32 = arith.constant 0 : i32
    %c0_i32_0 = arith.constant 0 : i32
    return %c0_i32, %arg0 : i32, i32
  }
  func.func @transform_1(%arg0: i32) -> (i32, i32) {
    %c0_i32 = arith.constant 0 : i32
    %c0_i32_0 = arith.constant 0 : i32
    %c0_i32_1 = arith.constant 0 : i32
    return %c0_i32, %c0_i32_0 : i32, i32
  }
  func.func @transform_2(%arg0: i32) -> (i32, i32) {
    %c0_i32 = arith.constant 0 : i32
    %c0_i32_0 = arith.constant 0 : i32
    %c0_i32_1 = arith.constant 0 : i32
    return %c0_i32, %c0_i32_0 : i32, i32
  }
  func.func @transform_3(%arg0: i32) -> (i32, i32) {
    %c0_i32 = arith.constant 0 : i32
    %c0_i32_0 = arith.constant 0 : i32
    %c0_i32_1 = arith.constant 0 : i32
    return %c0_i32, %c0_i32_0 : i32, i32
  }
  func.func @transform_4(%arg0: i32) -> (i32, i32) {
    %c0_i32 = arith.constant 0 : i32
    %c0_i32_0 = arith.constant 0 : i32
    %c0_i32_1 = arith.constant 0 : i32
    return %c0_i32, %c0_i32_0 : i32, i32
  }
  func.func @transform_5(%arg0: i32) -> (i32, i32) {
    %c0_i32 = arith.constant 0 : i32
    %c0_i32_0 = arith.constant 0 : i32
    return %c0_i32, %arg0 : i32, i32
  }
}

</mosaic_0001>

<bundles_post_ra>
// kernel: tpu_custom_call.1
= control target key start
LH: loop header
LB: loop body
LE: loop exit
PB: predicated region body
PF: predicated region fallthrough
CT: control target
= control target key end

     0   :  { %v545_v2 = vmov 1   ;;  %v546_v3 = vmov 0   ;;  %s703_s0 = inlined_call_operand.vmem [shape: f32[3,512], index: 0, kind: input, shape index: {}]   ;;  %s704_s1 = inlined_call_operand.vmem [shape: f32[32,3], index: 1, kind: input, shape index: {}]   ;;  %s705_s2 = inlined_call_operand.vmem [shape: f32[32,1], index: 2, kind: input, shape index: {}]   ;;  %s706_s3 = inlined_call_operand.vmem [shape: f32[3,32], index: 3, kind: input, shape index: {}]   ;;  %s707_s4 = inlined_call_operand.vmem [shape: f32[3,1], index: 4, kind: input, shape index: {}]   ;;  %s708_s5 = inlined_call_operand.hbm [shape: f32[3,512], index: 5, kind: output, shape index: {}]  }
   0x1   :  { %v30_v0 = vld [vmem:[%s705_s2 + $0x18] sm:$0xff]  ;;  %v25_v1 = vld [vmem:[%s704_s1 + $0x10] sm:$0xff]  ;;  %512 = vset.pattern.permute.xlu0 %v545_v2  ;;  %509 = vset.pattern.permute.xlu1 %v546_v3 }
   0x2   :  { %122 = vperm.xlu1 %509, %v30_v0   ;;  %150 = vperm.xlu0 %512, %v25_v1  }
   0x3   :  { %10 = vsyncpa [#allocation3], 0  ;;  %v26_v4 = vld [vmem:[%s704_s1 + $0x18] sm:$0xff]  ;;  %v29_v5 = vld [vmem:[%s705_s2 + $0x10] sm:$0xff]  ;;  %v547_v7 = vmov 2   ;;  %v548_v11 = vmov 0.0   ;;  %v53_v13 = vlaneseq }
   0x4   :  { %v24_v6 = vld [vmem:[%s704_s1 + $0x8] sm:$0xff]  ;;  %v23_v9 = vld [vmem:[%s704_s1] sm:$0xff]  ;;  %400 = vmatprep.mubr.f32.mxu0 %v548_v11  ;;  %471 = vmatprep.mubr.f32.mxu1 %v548_v11  ;;  %vm332_vm0 = vcmask 261120   ;;  %s549_s13 = smov [#allocation2]  }
   0x5   :  { %v28_v8 = vld [vmem:[%s705_s2 + $0x8] sm:$0xff]  ;;  %v27_v10 = vld [vmem:[%s705_s2] sm:$0xff]  ;;  %v54_v14 = vshrl.u32 %v53_v13, 7  ;;  %s494_s14 = sshll.u32 %s549_s13, 4  ;;  %s495_s14 = int_to_ptr.vmem [resolvable:$true] %s494_s14 }
   0x6   :  { %510 = vset.pattern.permute.xlu1 %v545_v2  ;;  %513 = vset.pattern.permute.xlu0 %v546_v3  ;;  %v326_v12 = vld [vmem:[%s707_s4] sm:$0x7]  ;;  %v22_v18 = vld [vmem:[%s703_s0 + $0x8] sm:$0x77]  ;;  %p528_p1 = scmp.lt.s32.totalorder %s495_s14, %s495_s14 }
   0x7   :  { %154 = vperm.xlu1 %510, %v26_v4   ;;  %48 = vperm.xlu0 %513, %v26_v4   ;;  %v55_v15 = vsub.s32 0, %v54_v14  ;;  %v59_v16 = vsub.s32 4, %v54_v14  ;;  %v21_v17 = vld [vmem:[%s703_s0] sm:$0x77]  ;;  %v159_v25 = vsub.s32 1, %v54_v14  ;;  %v163_v26 = vsub.s32 5, %v54_v14 }
   0x8   :  { %v243_v27 = vsub.s32 2, %v54_v14  ;;  %v247_v28 = vsub.s32 6, %v54_v14 }
   0x9   :  { %v56_v21 = vrot.slane %v21_v17, %v55_v15  ;;  %v60_v22 = vrot.slane %v21_v17, %v59_v16  ;;  %v64_v23 = vrot.slane %v22_v18, %v55_v15  ;;  %v68_v24 = vrot.slane %v22_v18, %v59_v16 }
   0xa   :  { %v160_v35 = vrot.slane %v21_v17, %v159_v25  ;;  %v164_v36 = vrot.slane %v21_v17, %v163_v26  ;;  %v168_v37 = vrot.slane %v22_v18, %v159_v25  ;;  %v172_v38 = vrot.slane %v22_v18, %v163_v26 }
   0xb   :  { %511 = vset.pattern.permute.xlu1 %v546_v3  ;;  %43 = vperm.xlu0 %513, %v25_v1   ;;  %v615_v31 = vrot.slane %v56_v21, %v55_v15  ;;  %v617_v32 = vrot.slane %v60_v22, %v55_v15  ;;  %v619_v33 = vrot.slane %v64_v23, %v55_v15 }
   0xc   :  { %117 = vperm.xlu1 %511, %v29_v5   ;;  %v621_v34 = vrot.slane %v68_v24, %v55_v15  ;;  %v248_v39 = vrot.slane %v21_v17, %v247_v28  ;;  %v256_v40 = vrot.slane %v22_v18, %v247_v28  ;;  %v244_v41 = vrot.slane %v21_v17, %v243_v27 }
   0xd   :  { %v252_v42 = vrot.slane %v22_v18, %v243_v27  ;;  %v627_v49 = vrot.slane %v160_v35, %v159_v25  ;;  %v629_v50 = vrot.slane %v164_v36, %v159_v25  ;;  %v631_v51 = vrot.slane %v168_v37, %v159_v25 }
   0xe   :  { %v633_v52 = vrot.slane %v172_v38, %v159_v25  ;;  %v635_v53 = vrot.slane %v248_v39, %v243_v27  ;;  %v637_v54 = vrot.slane %v256_v40, %v243_v27  ;;  %v639_v55 = vrot.slane %v244_v41, %v243_v27 }
   0xf   :  { %38 = vperm.xlu0 %513, %v24_v6   ;;  %v641_v56 = vrot.slane %v252_v42, %v243_v27 }
  0x10   :  { %514 = vset.pattern.permute.xlu1 %v547_v7 }
  0x11   :  { %238 = vperm.xlu1 %514, %v26_v4  }
  0x13   :  { %112 = vperm.xlu0 %513, %v28_v8  }
  0x15   :  { %515 = vset.pattern.permute.xlu1 %v546_v3 }
  0x16   :  { %33 = vperm.xlu1 %515, %v23_v9  }
  0x17   :  { %107 = vperm.xlu0 %513, %v27_v10  }
  0x1a   :  { %516 = vset.pattern.permute.xlu1 %v545_v2 }
  0x1b   :  { %146 = vperm.xlu1 %516, %v24_v6   ;;  %519 = vset.pattern.permute.xlu0 %v547_v7 }
  0x1c   :  { %230 = vperm.xlu0 %519, %v24_v6  }
  0x1f   :  { %517 = vset.pattern.permute.xlu1 %v547_v7 }
  0x20   :  { %234 = vperm.xlu1 %517, %v25_v1   ;;  %522 = vset.pattern.permute.xlu0 %v546_v3 }
  0x24   :  { %518 = vset.pattern.permute.xlu1 %v545_v2 }
  0x25   :  { %142 = vperm.xlu1 %518, %v23_v9  }
  0x29   :  { %520 = vset.pattern.permute.xlu1 %v547_v7 }
  0x2a   :  { %226 = vperm.xlu1 %520, %v23_v9  }
  0x2e   :  { %521 = vset.pattern.permute.xlu1 %v546_v3 }
  0x2f   :  { %329 = vperm.xlu1 %521, %v326_v12  }
  0x7d   :  { %v123_v19 = vpop.permute.xlu1 %122  ;;  %v613_v20 = vpop.permute.xlu0 %150 }
  0x7e   :  { %v201_v16 = vmul.f32 %v627_v49, %v613_v20  ;;  %v202_v22 = vmul.f32 %v629_v50, %v613_v20  ;;  %v203_v35 = vmul.f32 %v631_v51, %v613_v20  ;;  %v204_v36 = vmul.f32 %v633_v52, %v613_v20 }
  0x82   :  { %v155_v29 = vpop.permute.xlu1 %154  ;;  %v49_v30 = vpop.permute.xlu0 %48 }
  0x83   :  { %v101_v43 = vmul.f32 %v615_v31, %v49_v30  ;;  %v102_v44 = vmul.f32 %v617_v32, %v49_v30  ;;  %v103_v45 = vmul.f32 %v619_v33, %v49_v30  ;;  %v104_v46 = vmul.f32 %v621_v34, %v49_v30 }
  0x84   :  { %v205_v62 = vmul.f32 %v627_v49, %v155_v29  ;;  %v207_v63 = vmul.f32 %v631_v51, %v155_v29  ;;  %v206_v1 = vmul.f32 %v629_v50, %v155_v29  ;;  %v208_v2 = vmul.f32 %v633_v52, %v155_v29 }
  0x85   :  { %v138_v58 = vadd.f32 %v123_v19, %v102_v44  ;;  %v140_v59 = vadd.f32 %v123_v19, %v104_v46  ;;  %v137_v60 = vadd.f32 %v123_v19, %v101_v43  ;;  %v139_v61 = vadd.f32 %v123_v19, %v103_v45 }
  0x86   :  { %v44_v47 = vpop.permute.xlu0 %43 }
  0x87   :  { %v118_v48 = vpop.permute.xlu1 %117  ;;  %v222_v8 = vadd.f32 %v206_v1, %v138_v58  ;;  %v224_v9 = vadd.f32 %v208_v2, %v140_v59  ;;  %v221_v10 = vadd.f32 %v205_v62, %v137_v60  ;;  %v223_v11 = vadd.f32 %v207_v63, %v139_v61 }
  0x88   :  { %v97_v17 = vmul.f32 %v615_v31, %v44_v47  ;;  %v98_v18 = vmul.f32 %v617_v32, %v44_v47  ;;  %v99_v19 = vmul.f32 %v619_v33, %v44_v47  ;;  %v100_v23 = vmul.f32 %v621_v34, %v44_v47 }
  0x8a   :  { %v39_v57 = vpop.permute.xlu0 %38  ;;  %v133_v39 = vadd.f32 %v118_v48, %v97_v17  ;;  %v134_v40 = vadd.f32 %v118_v48, %v98_v18  ;;  %v135_v41 = vadd.f32 %v118_v48, %v99_v19  ;;  %v136_v42 = vadd.f32 %v118_v48, %v100_v23 }
  0x8b   :  { %v94_v24 = vmul.f32 %v617_v32, %v39_v57  ;;  %v96_v25 = vmul.f32 %v621_v34, %v39_v57  ;;  %v93_v37 = vmul.f32 %v615_v31, %v39_v57  ;;  %v95_v38 = vmul.f32 %v619_v33, %v39_v57 }
  0x8c   :  { %v239_v0 = vpop.permute.xlu1 %238  ;;  %v220_v1 = vadd.f32 %v204_v36, %v136_v42  ;;  %v217_v2 = vadd.f32 %v201_v16, %v133_v39 }
  0x8d   :  { %v290_v3 = vmul.f32 %v635_v53, %v239_v0  ;;  %v292_v4 = vmul.f32 %v637_v54, %v239_v0  ;;  %v289_v5 = vmul.f32 %v639_v55, %v239_v0  ;;  %v291_v6 = vmul.f32 %v641_v56, %v239_v0 }
  0x8e   :  { %v113_v7 = vpop.permute.xlu0 %112  ;;  %v218_v0 = vadd.f32 %v202_v22, %v134_v40 }
  0x8f   :  { %v306_v12 = vadd.f32 %v290_v3, %v222_v8  ;;  %v308_v13 = vadd.f32 %v292_v4, %v224_v9  ;;  %v305_v14 = vadd.f32 %v289_v5, %v221_v10  ;;  %v307_v15 = vadd.f32 %v291_v6, %v223_v11 }
  0x90   :  { %v130_v43 = vadd.f32 %v113_v7, %v94_v24  ;;  %v132_v44 = vadd.f32 %v113_v7, %v96_v25  ;;  %v129_v59 = vadd.f32 %v113_v7, %v93_v37  ;;  %v131_v60 = vadd.f32 %v113_v7, %v95_v38 }
  0x91   :  { %v34_v21 = vpop.permute.xlu1 %33  ;;  %v322_v27 = vmax.f32 %v306_v12, 0.0  ;;  %v324_v28 = vmax.f32 %v308_v13, 0.0  ;;  %v321_v29 = vmax.f32 %v305_v14, 0.0  ;;  %v323_v30 = vmax.f32 %v307_v15, 0.0 }
  0x92   :  { %v661_v26 = vpop.permute.xlu0 %107  ;;  %v219_v3 = vadd.f32 %v203_v35, %v135_v41  ;;  %v89_v13 = vmul.f32 %v615_v31, %v34_v21  ;;  %v90_v14 = vmul.f32 %v617_v32, %v34_v21  ;;  %v91_v23 = vmul.f32 %v619_v33, %v34_v21 }
  0x93   :  { %360 = vmatprep.subr.mxu0 %v322_v27  ;;  %431 = vmatprep.subr.mxu1 %v324_v28  ;;  %v92_v24 = vmul.f32 %v621_v34, %v34_v21 }
  0x94   :  { %361 = vmatpush1.msra.mxu0 %v321_v29  ;;  %432 = vmatpush1.msra.mxu1 %v323_v30  ;;  %v125_v39 = vadd.f32 %v661_v26, %v89_v13  ;;  %v126_v33 = vadd.f32 %v661_v26, %v90_v14  ;;  %v127_v40 = vadd.f32 %v661_v26, %v91_v23 }
  0x95   :  { %v128_v41 = vadd.f32 %v661_v26, %v92_v24 }
  0x96   :  { %v147_v45 = vpop.permute.xlu1 %146 }
  0x97   :  { %v197_v46 = vmul.f32 %v627_v49, %v147_v45  ;;  %v198_v47 = vmul.f32 %v629_v50, %v147_v45  ;;  %v199_v20 = vmul.f32 %v631_v51, %v147_v45  ;;  %v200_v58 = vmul.f32 %v633_v52, %v147_v45  ;;  %v231_v57 = vpop.permute.xlu0 %230 }
  0x98   :  { %v282_v61 = vmul.f32 %v635_v53, %v231_v57  ;;  %v284_v48 = vmul.f32 %v637_v54, %v231_v57  ;;  %v281_v4 = vmul.f32 %v639_v55, %v231_v57  ;;  %v283_v5 = vmul.f32 %v641_v56, %v231_v57 }
  0x99   :  { %v214_v62 = vadd.f32 %v198_v47, %v130_v43  ;;  %v216_v63 = vadd.f32 %v200_v58, %v132_v44  ;;  %v213_v8 = vadd.f32 %v197_v46, %v129_v59  ;;  %v215_v9 = vadd.f32 %v199_v20, %v131_v60 }
  0x9b   :  { %v235_v6 = vpop.permute.xlu1 %234  ;;  %v298_v15 = vadd.f32 %v282_v61, %v214_v62  ;;  %v300_v16 = vadd.f32 %v284_v48, %v216_v63  ;;  %v297_v25 = vadd.f32 %v281_v4, %v213_v8  ;;  %v299_v27 = vadd.f32 %v283_v5, %v215_v9  ;;  %v325_v63 = vld [vmem:[%s706_s3] sm:$0x7]  ;;  %s523_s3 = scalar_lea.vmem %s495_s14, 256 }
  0x9c   :  { %v285_v10 = vmul.f32 %v639_v55, %v235_v6  ;;  %v286_v7 = vmul.f32 %v635_v53, %v235_v6  ;;  %v287_v11 = vmul.f32 %v641_v56, %v235_v6  ;;  %v288_v12 = vmul.f32 %v637_v54, %v235_v6  ;;  %p524_p0 = scmp.ne.s32.totalorder %s495_s14, %s523_s3  ;;  %p529_p2 = scmp.lt.s32.totalorder %s523_s3, %s523_s3 }
  0x9d   :  { %v314_v34 = vmax.f32 %v298_v15, 0.0  ;;  %v316_v21 = vmax.f32 %v300_v16, 0.0 }
  0x9e   :  { %v302_v17 = vadd.f32 %v286_v7, %v218_v0  ;;  %v304_v18 = vadd.f32 %v288_v12, %v220_v1  ;;  %v301_v19 = vadd.f32 %v285_v10, %v217_v2  ;;  %v303_v22 = vadd.f32 %v287_v11, %v219_v3  ;;  %p530_p3 = por %p529_p2, %p528_p1 }
  0xa0   :  { %v143_v28 = vpop.permute.xlu1 %142  ;;  %v318_v29 = vmax.f32 %v302_v17, 0.0  ;;  %v320_v30 = vmax.f32 %v304_v18, 0.0  ;;  %v317_v35 = vmax.f32 %v301_v19, 0.0  ;;  %v319_v36 = vmax.f32 %v303_v22, 0.0  ;;  %p531_p4 = pnand %p530_p3, %p524_p0 }
  0xa1   :  { %v193_v31 = vmul.f32 %v627_v49, %v143_v28  ;;  %v194_v32 = vmul.f32 %v629_v50, %v143_v28  ;;  %v195_v37 = vmul.f32 %v631_v51, %v143_v28  ;;  %v196_v38 = vmul.f32 %v633_v52, %v143_v28 }
  0xa2   :  { %362 = vmatprep.subr.mxu0 %v318_v29  ;;  %433 = vmatprep.subr.mxu1 %v320_v30  ;;  %v313_v49 = vmax.f32 %v297_v25, 0.0  ;;  %v315_v50 = vmax.f32 %v299_v27, 0.0 }
  0xa3   :  { %363 = vmatpush1.msra.mxu0 %v317_v35  ;;  %434 = vmatpush1.msra.mxu1 %v319_v36  ;;  %v210_v51 = vadd.f32 %v194_v32, %v126_v33  ;;  %v212_v42 = vadd.f32 %v196_v38, %v128_v41  ;;  %v209_v43 = vadd.f32 %v193_v31, %v125_v39 }
  0xa4   :  { %364 = vmatprep.subr.mxu0 %v314_v34  ;;  %435 = vmatprep.subr.mxu1 %v316_v21  ;;  %v211_v44 = vadd.f32 %v195_v37, %v127_v40 }
  0xa5   :  { %v227_v52 = vpop.permute.xlu1 %226  ;;  %365 = vmatpush1.msra.mxu0 %v313_v49  ;;  %436 = vmatpush1.msra.mxu1 %v315_v50 }
  0xa6   :  { %v277_v45 = vmul.f32 %v639_v55, %v227_v52  ;;  %v278_v46 = vmul.f32 %v635_v53, %v227_v52  ;;  %v279_v47 = vmul.f32 %v641_v56, %v227_v52  ;;  %v280_v26 = vmul.f32 %v637_v54, %v227_v52 }
  0xa8   :  { %v294_v20 = vadd.f32 %v278_v46, %v210_v51  ;;  %v296_v58 = vadd.f32 %v280_v26, %v212_v42  ;;  %v293_v57 = vadd.f32 %v277_v45, %v209_v43  ;;  %v295_v59 = vadd.f32 %v279_v47, %v211_v44 }
  0xaa   :  { %v310_v60 = vmax.f32 %v294_v20, 0.0  ;;  %v312_v61 = vmax.f32 %v296_v58, 0.0  ;;  %v309_v48 = vmax.f32 %v293_v57, 0.0  ;;  %v311_v62 = vmax.f32 %v295_v59, 0.0  ;;  %v330_v53 = vpop.permute.xlu1 %329 }
  0xac   :  { %366 = vmatprep.subr.mxu0 %v310_v60  ;;  %437 = vmatprep.subr.mxu1 %v312_v61 }
  0xad   :  { %367 = vmatpush1.msra.mxu0 %v309_v48  ;;  %438 = vmatpush1.msra.mxu1 %v311_v62 }
  0xae   :  { %502 = vmatmul.mubr.msk.f32.vlgmr.msra.gmra.mxu0 %vm332_vm0, %v325_v63  ;;  %503 = vmatmul.mubr.msk.f32.vlgmr.msra.gmra.mxu1 %vm332_vm0, %v325_v63 }
 0x16e   :  { %v402_v54 = vpop.f32.mrf.mxu0  ;;  %v473_v55 = vpop.f32.mrf.mxu1 }
 0x16f   :  { %v403_v1 = vadd.f32 %v402_v54, %v330_v53  ;;  %v474_v2 = vadd.f32 %v473_v55, %v330_v53 }
 0x170   :  { %v404_v56 = vpop.f32.mrf.mxu0  ;;  %v475_v0 = vpop.f32.mrf.mxu1 }
 0x171   :  { %v405_v3 = vadd.f32 %v404_v56, %v330_v53  ;;  %v476_v4 = vadd.f32 %v475_v0, %v330_v53 }
 0x173   :  { %v482_v5 = vcombine.low %v403_v1, %v405_v3  ;;  %v483_v6 = vcombine.low %v474_v2, %v476_v4 }
 0x175   :  { %486 = vst [vmem:[#allocation2] sm:$0x77] %v482_v5  ;;  %487 = vst [vmem:[#allocation2 + $0x8] sm:$0x77] %v483_v6 }
 0x176   :  { %534 = shalt.err (!%p531_p4)
}
 0x177   :  { %497 = dma.vmem_to_hbm [thread:$0]  %s495_s14, 256, %s708_s5, [#allocation3]  }
 0x178   :  { %543 = dma.done.wait [#allocation3], 256  }
 0x179   :  { %544 = vsyncadd [#allocation3], 4294967040 }
 0x17a   :  { %501 = vsyncpa [#allocation3], 1 }

</bundles_post_ra>
